<compile_context>
chip_gen: v6e
topology: v6e:2x2x1
jax: 0.10.0
libtpu: 0.0.40
codegen_flags: <defaults>
</compile_context>

<pallas_src>
import jax
import jax.numpy as jnp
from jax.experimental import pallas as pl
from jax.experimental.pallas import tpu as pltpu

_DEFAULT_MEAN = (102.9801, 115.9465, 122.7717)
_DEFAULT_STD = (1.0, 1.0, 1.0)


def _norm_tiled_kernel(inv_ref, bias_ref, img_ref, out_ref):
    # inv_ref / bias_ref: (1, C, 1, 128) f32 lane-replicated per-channel constants
    # img_ref / out_ref : (1, C, TR, 128) f32 tile
    out_ref[...] = img_ref[...] * inv_ref[...] + bias_ref[...]


def _norm_plane_kernel(inv_ref, bias_ref, img_ref, out_ref):
    # Fallback path (H*W not a multiple of 128): one (H, W) plane per (n, c) step.
    # inv_ref / bias_ref: (C,) f32 in SMEM.
    c = pl.program_id(1)
    out_ref[...] = img_ref[...] * inv_ref[c] + bias_ref[c]


def lsd_data_layer(img, mean=None, std=None, *, row_tile=1024):
    """Pallas equivalent of LSDDataLayer.forward (per-channel normalize)."""
    assert img.ndim == 4 and img.shape[1] == 3, "expect NCHW with C == 3"
    N, C, H, W = img.shape

    mean = jnp.asarray(_DEFAULT_MEAN if mean is None else mean, jnp.float32)
    std = jnp.asarray(_DEFAULT_STD if std is None else std, jnp.float32)
    inv_std = 1.0 / std            # (C,) scalars, computed once on host/XLA side
    bias = -mean * inv_std         # out = img * inv_std + bias == (img - mean) / std

    img_f32 = img.astype(jnp.float32)  # PyTorch layer produces float output
    hw = H * W
    cost = pl.CostEstimate(
        flops=2 * N * C * hw, transcendentals=0, bytes_accessed=2 * N * C * hw * 4
    )

    if hw % 128 == 0:
        # Lane-dense main path: view each plane as (R, 128); tile the row axis.
        R = hw // 128
        tr = R if R <= row_tile else row_tile  # row_tile is a multiple of 8
        grid = (N, pl.cdiv(R, tr))
        x = img_f32.reshape(N, C, R, 128)
        inv_b = jnp.broadcast_to(inv_std.reshape(1, C, 1, 1), (1, C, 1, 128))
        bias_b = jnp.broadcast_to(bias.reshape(1, C, 1, 1), (1, C, 1, 128))

        out = pl.pallas_call(
            _norm_tiled_kernel,
            out_shape=jax.ShapeDtypeStruct((N, C, R, 128), jnp.float32),
            grid_spec=pltpu.PrefetchScalarGridSpec(
                num_scalar_prefetch=0,
                grid=grid,
                in_specs=[
                    pl.BlockSpec((1, C, 1, 128), lambda n, r: (0, 0, 0, 0)),
                    pl.BlockSpec((1, C, 1, 128), lambda n, r: (0, 0, 0, 0)),
                    pl.BlockSpec((1, C, tr, 128), lambda n, r: (n, 0, r, 0)),
                ],
                out_specs=pl.BlockSpec((1, C, tr, 128), lambda n, r: (n, 0, r, 0)),
            ),
            compiler_params=pltpu.CompilerParams(
                dimension_semantics=("parallel", "parallel"),
            ),
            cost_estimate=cost,
        )(inv_b, bias_b, x)
        return out.reshape(N, C, H, W)

    # Fallback for odd H*W (not a multiple of 128): whole-plane blocks.
    # TODO(synk): could pad H*W to a 128 multiple wrapper-side to always hit the
    # lane-dense path; kept simple since common image sizes already qualify.
    out = pl.pallas_call(
        _norm_plane_kernel,
        out_shape=jax.ShapeDtypeStruct((N, C, H, W), jnp.float32),
        grid_spec=pltpu.PrefetchScalarGridSpec(
            num_scalar_prefetch=0,
            grid=(N, C),
            in_specs=[
                pl.BlockSpec(memory_space=pltpu.MemorySpace.SMEM),  # inv_std (3,)
                pl.BlockSpec(memory_space=pltpu.MemorySpace.SMEM),  # bias    (3,)
                pl.BlockSpec((1, 1, H, W), lambda n, c: (n, c, 0, 0)),
            ],
            out_specs=pl.BlockSpec((1, 1, H, W), lambda n, c: (n, c, 0, 0)),
        ),
        compiler_params=pltpu.CompilerParams(
            dimension_semantics=("parallel", "parallel"),
        ),
        cost_estimate=cost,
    )(inv_std, bias, img_f32)
    return out


if __name__ == "__main__":
    key = jax.random.PRNGKey(0)
    # Small NCHW image batch consistent with the module: batch=2, C=3, 16x16
    img = jax.random.uniform(
        key, (2, 3, 16, 16), dtype=jnp.float32, minval=0.0, maxval=255.0
    )

    out = lsd_data_layer(img)
    out = jax.block_until_ready(out)

    # Reference check against plain-JAX semantics of the PyTorch module.
    mean = jnp.asarray(_DEFAULT_MEAN, dtype=jnp.float32)
    std = jnp.asarray(_DEFAULT_STD, dtype=jnp.float32)
    ref = (img - mean[None, :, None, None]) / std[None, :, None, None]
    assert out.dtype == jnp.float32
    assert jnp.allclose(out, ref, atol=1e-5, rtol=1e-5), "mismatch vs reference"

    print("KERNEL_OK")
</pallas_src>

<mosaic_0001>
module attributes {stable_mosaic.version = 11 : i64} {
  func.func @_norm_tiled_kernel(%arg0: i32, %arg1: i32, %arg2: memref<1x3x1x128xf32, #tpu.memory_space<vmem>>, %arg3: memref<1x3x1x128xf32, #tpu.memory_space<vmem>>, %arg4: memref<1x3x2x128xf32, #tpu.memory_space<vmem>>, %arg5: memref<1x3x2x128xf32, #tpu.memory_space<vmem>>) attributes {dimension_semantics = [#tpu.dimension_semantics<parallel>, #tpu.dimension_semantics<parallel>], iteration_bounds = array<i64: 2, 1>, scalar_prefetch = 0 : i64, scratch_operands = 0 : i64, tpu.core_type = #tpu.core_type<tc>, window_params = [{pipeline_mode = #tpu.pipeline_mode<synchronous>, transform_indices = @transform_0, window_bounds = array<i64: 1, 3, 1, 128>}, {pipeline_mode = #tpu.pipeline_mode<synchronous>, transform_indices = @transform_1, window_bounds = array<i64: 1, 3, 1, 128>}, {transform_indices = @transform_2, window_bounds = array<i64: 1, 3, 2, 128>}, {transform_indices = @transform_3, window_bounds = array<i64: 1, 3, 2, 128>}]} {
    %c0 = arith.constant 0 : index
    %c0_0 = arith.constant 0 : index
    %c0_1 = arith.constant 0 : index
    %c0_2 = arith.constant 0 : index
    %0 = vector.load %arg4[%c0, %c0_0, %c0_1, %c0_2] : memref<1x3x2x128xf32, #tpu.memory_space<vmem>>, vector<1x3x2x128xf32>
    %c0_3 = arith.constant 0 : index
    %c0_4 = arith.constant 0 : index
    %c0_5 = arith.constant 0 : index
    %c0_6 = arith.constant 0 : index
    %1 = vector.load %arg2[%c0_3, %c0_4, %c0_5, %c0_6] : memref<1x3x1x128xf32, #tpu.memory_space<vmem>>, vector<1x3x1x128xf32>
    %2 = vector.broadcast %1 : vector<1x3x1x128xf32> to vector<1x3x2x128xf32>
    %3 = arith.mulf %0, %2 : vector<1x3x2x128xf32>
    %c0_7 = arith.constant 0 : index
    %c0_8 = arith.constant 0 : index
    %c0_9 = arith.constant 0 : index
    %c0_10 = arith.constant 0 : index
    %4 = vector.load %arg3[%c0_7, %c0_8, %c0_9, %c0_10] : memref<1x3x1x128xf32, #tpu.memory_space<vmem>>, vector<1x3x1x128xf32>
    %5 = vector.broadcast %4 : vector<1x3x1x128xf32> to vector<1x3x2x128xf32>
    %6 = arith.addf %3, %5 : vector<1x3x2x128xf32>
    %c0_11 = arith.constant 0 : index
    %c0_12 = arith.constant 0 : index
    %c0_13 = arith.constant 0 : index
    %c0_14 = arith.constant 0 : index
    %7 = vector.load %arg5[%c0_11, %c0_12, %c0_13, %c0_14] : memref<1x3x2x128xf32, #tpu.memory_space<vmem>>, vector<1x3x2x128xf32>
    tpu.vector_store %arg5[%c0_11, %c0_12, %c0_13, %c0_14], %6 {strides = array<i32>} : memref<1x3x2x128xf32, #tpu.memory_space<vmem>>, vector<1x3x2x128xf32>,
    return
  }
  func.func @transform_0(%arg0: i32, %arg1: i32) -> (i32, i32, i32, i32) {
    %c0_i32 = arith.constant 0 : i32
    %c0_i32_0 = arith.constant 0 : i32
    %c0_i32_1 = arith.constant 0 : i32
    %c0_i32_2 = arith.constant 0 : i32
    %c0_i32_3 = arith.constant 0 : i32
    return %c0_i32, %c0_i32_0, %c0_i32_1, %c0_i32_2 : i32, i32, i32, i32
  }
  func.func @transform_1(%arg0: i32, %arg1: i32) -> (i32, i32, i32, i32) {
    %c0_i32 = arith.constant 0 : i32
    %c0_i32_0 = arith.constant 0 : i32
    %c0_i32_1 = arith.constant 0 : i32
    %c0_i32_2 = arith.constant 0 : i32
    %c0_i32_3 = arith.constant 0 : i32
    return %c0_i32, %c0_i32_0, %c0_i32_1, %c0_i32_2 : i32, i32, i32, i32
  }
  func.func @transform_2(%arg0: i32, %arg1: i32) -> (i32, i32, i32, i32) {
    %c0_i32 = arith.constant 0 : i32
    %c0_i32_0 = arith.constant 0 : i32
    %c0_i32_1 = arith.constant 0 : i32
    return %arg0, %c0_i32, %arg1, %c0_i32_0 : i32, i32, i32, i32
  }
  func.func @transform_3(%arg0: i32, %arg1: i32) -> (i32, i32, i32, i32) {
    %c0_i32 = arith.constant 0 : i32
    %c0_i32_0 = arith.constant 0 : i32
    %c0_i32_1 = arith.constant 0 : i32
    return %arg0, %c0_i32, %arg1, %c0_i32_0 : i32, i32, i32, i32
  }
}

</mosaic_0001>

<bundles_post_ra>
// kernel: tpu_custom_call.1
= control target key start
LH: loop header
LB: loop body
LE: loop exit
PB: predicated region body
PF: predicated region fallthrough
CT: control target
= control target key end

     0   :  { %s908_s0 = inlined_call_operand.hbm [shape: f32[1,3,1,128], index: 0, kind: input, shape index: {}]   ;;  %s909_s1 = inlined_call_operand.hbm [shape: f32[1,3,1,128], index: 1, kind: input, shape index: {}]   ;;  %s910_s2 = inlined_call_operand.hbm [shape: f32[2,3,2,128], index: 2, kind: input, shape index: {}]   ;;  %s911_s3 = inlined_call_operand.hbm [shape: f32[2,3,2,128], index: 3, kind: output, shape index: {}]  }
   0x1   :  { %914 = sst [smem:[#allocation13_spill]] %s908_s0 }
   0x2   :  { %8 = vsyncpa [#allocation3], 0 }
   0x3   :  { %9 = vsyncpa [#allocation6], 0 }
   0x4   :  { %10 = vsyncpa [#allocation4], 0 }
   0x5   :  { %12 = vsyncpa [#allocation4 + $0x1], 0  ;;  %s718_s12 = smov 0   ;;  %s720_s13 = smov 0  }
   0x6   :  { %s722_s14 = smov 0   ;;  %s724_s15 = smov 0  }
   0x7   :  { %s726_s16 = smov 0   ;;  %s728_s17 = smov 0  }
   0x8 LB: > { %s749_s18 = sadd.s32 4294967295, %s686_s17   ;;  %s407_s19 = sadd.s32 4294967294, %s686_s17   ;;  %s686_s17 = sphi %s728_s17, %s18_s17   ;;  %s682_s16 = sphi %s726_s16, %s934_s16   ;;  %s678_s15 = sphi %s724_s15, %s933_s15   ;;  %s674_s14 = sphi %s722_s14, %s932_s14   ;;  %s670_s13 = sphi %s720_s13, %s931_s13   ;;  %s666_s12 = sphi %s718_s12, %s930_s12  }
   0x9   : > { %s81_s20 = sadd.s32 1, %s674_s14  ;;  %p88_p0 = scmp.ne.s32.totalorder %s674_s14, %s670_s13 }
   0xa   : > { %p89_p1 = scmp.eq.s32.totalorder %s686_s17, 0  ;;  %p94_p2 = scmp.ne.s32.totalorder %s670_s13, %s666_s12 }
   0xb   : > { %p912_p3 = scmp.eq.s32.totalorder %s749_s18, 0  ;;  %p120_p4 = scmp.eq.s32.totalorder %s749_s18, 1 }
   0xc   : > { %p760_p5 = por %p89_p1, %p88_p0  ;;  %p126_p6 = scmp.eq.s32.totalorder %s407_s19, 1 }
   0xd   : > { %p766_p7 = por %p912_p3, %p94_p2  ;;  %p770_p8 = por %p120_p4, %p88_p0 }
   0xe   : > { %p774_p9 = por %p126_p6, %p94_p2  ;;  %p408_p10 = scmp.ge.s32.totalorder %s686_s17, 1 }
   0xf   : > { %s917_s23 = scalar_select %p770_p8, 1, 0 }
  0x10   : > { %s918_s24 = scalar_select %p774_p9, 1, 0 }
  0x11   : > { %p133_p11 = scmp.lt.s32.totalorder %s686_s17, 3  ;;  %s688_s26 = smov [#allocation2]  }
  0x12   : > { %s145_s27 = sshll.u32 %s688_s26, 4  ;;  %p458_p1 = scmp.lt.s32.totalorder %s686_s17, 2  ;;  %s146_s27 = int_to_ptr.vmem [resolvable:$true] %s145_s27 }
  0x13   : > { %p780_p12 = pnand %p408_p10, %p133_p11  ;;  %s689_s29 = smov [#allocation5]  }
  0x14   : > { %s158_s30 = sshll.u32 %s689_s29, 4  ;;  %p796_p2 = pnand %p458_p1, %p760_p5  ;;  %s159_s30 = int_to_ptr.vmem [resolvable:$true] %s158_s30 }
  0x15   : > { %p441_p13 = pneg %p780_p12  ;;  %s529_s5 = scalar_lea.vmem %s146_s27, 48 }
  0x16   : > { %p530_p10 = scmp.ne.s32.totalorder %s146_s27, %s529_s5  ;;  %s536_s6 = scalar_lea.vmem %s146_s27, 64 }
  0x17   : > { %p790_p4 = pnand %p441_p13, %p912_p3  ;;  %p537_p0 = scmp.lt.s32.totalorder %s146_s27, %s146_s27 }
  0x18   : > { %p538_p3 = scmp.lt.s32.totalorder %s536_s6, %s529_s5 }
  0x19   : > { %p520_p6 = pneg %p790_p4 }
  0x1a   : > { %p539_p9 = por %p538_p3, %p537_p0 }
  0x1b   : > { %p532_p11 = pnand %p530_p10, %p520_p6 }
  0x1d   : > { %p533_p13 = pneg %p532_p11 }
  0x1f   : > { %p540_p8 = pnand %p539_p9, %p533_p13 }
  0x21   : > { %543 = shalt.err (!%p540_p8)
}
  0x22   : > { %s690_s7 = smov 16   ;;  %s691_s8 = smov 1  }
  0x23   : > { %s922_s0 = sld [smem:[#allocation13_spill]]  ;;  %s555_s11 = scalar_lea.vmem %s159_s30, 48 }
  0x24   : > { %p556_p5 = scmp.ne.s32.totalorder %s159_s30, %s555_s11  ;;  %s562_s19 = scalar_lea.vmem %s159_s30, 64 }
  0x25   : > { %p563_p11 = scmp.lt.s32.totalorder %s159_s30, %s159_s30  ;;  %p564_p3 = scmp.lt.s32.totalorder %s562_s19, %s555_s11 }
  0x26   : > { %p558_p1 = pnand %p556_p5, %p520_p6 }
  0x27   : > { %p565_p9 = por %p564_p3, %p563_p11 }
  0x28   : > { %p559_p10 = pneg %p558_p1 }
  0x29   : > { %444 = dma.hbm_to_vmem [thread:$0]  (!%p790_p4), %s922_s0, 48, %s146_s27, [#allocation3], %s690_s7, %s690_s7, %s691_s8  }
  0x2a   : > { %p566_p8 = pnand %p565_p9, %p559_p10 }
  0x2c   : > { %569 = shalt.err (!%p566_p8)
}
  0x2d   : > { %447 = dma.hbm_to_vmem [thread:$0]  (!%p790_p4), %s909_s1, 48, %s159_s30, [#allocation6], %s690_s7, %s690_s7, %s691_s8  }
  0x2e   : > { %s30_s27 = sadd.s32 1, %s682_s16  ;;  %s172_s29 = sand.u32 1, %s686_s17  }
  0x2f   : > { %p32_p0 = scmp.ge.s32.totalorder %s30_s27, 2  ;;  %s174_s5 = sand.u32 1, %s674_s14  }
  0x30   : > { %s426_s6 = smul.u32 96, %s682_s16  ;;  %s173_s7 = scalar_lea.sflag [#allocation3], %s172_s29 }
  0x31   : > { %s936_s27 = smov (%p32_p0, %s30_s27), 0  ;;  %s425_s28 = smul.u32 6, %s174_s5 }
  0x32   : > { %s183_s11 = scalar_lea.hbm %s910_s2, %s426_s6  ;;  %s76_s19 = ssub.s32 %s682_s16, %s936_s27 }
  0x33   : > { %p79_p6 = scmp.eq.s32.totalorder %s76_s19, 0  ;;  %s176_s21 = scalar_lea.vmem [#allocation7], %s425_s28 }
  0x34   : > { %s184_s26 = sshll.u32 %s176_s21, 4  ;;  %p572_p4 = pneg %p796_p2  ;;  %s185_s26 = int_to_ptr.vmem [resolvable:$true] %s184_s26 }
  0x35   : > { %s832_s30 = scalar_select %p79_p6, %s674_s14, %s81_s20  }
  0x36   : > { %s583_s8 = scalar_lea.vmem %s185_s26, 96  ;;  %s692_s5 = smov [#allocation7]  }
  0x37   : > { %p584_p13 = scmp.ne.s32.totalorder %s185_s26, %s583_s8  ;;  %s588_s0 = sshll.u32 %s692_s5, 4  ;;  %s589_s0 = int_to_ptr.vmem [resolvable:$false] %s588_s0 }
  0x38   : > { %s590_s9 = scalar_lea.vmem %s589_s0, 192  ;;  %p591_p10 = scmp.lt.s32.totalorder %s185_s26, %s589_s0 }
  0x39   : > { %p586_p5 = pnand %p584_p13, %p572_p4  ;;  %p592_p11 = scmp.lt.s32.totalorder %s590_s9, %s583_s8 }
  0x3b   : > { %p587_p1 = pneg %p586_p5  ;;  %p593_p3 = por %p592_p11, %p591_p10 }
  0x3d   : > { %p594_p9 = pnand %p593_p3, %p587_p1 }
  0x3f   : > { %597 = shalt.err (!%p594_p9)
}
  0x40   : > { %s693_s6 = smov 32   ;;  %s694_s20 = smov 2  }
  0x41   : > { %451 = dma.hbm_to_vmem [thread:$0]  (!%p796_p2), %s183_s11, 96, %s185_s26, %s173_s7, %s693_s6, %s693_s6, %s694_s20  }
  0x42   : > { %196 = sbr.rel (%p780_p12) target bundleno = 108 (0x6c), region = 32  ;;  %p923_p8 = scmp.eq.s32.totalorder (!%p780_p12), %s749_s18, 0 }
  0x47   : > { %649 = dma.done.wait (%p923_p8), [#allocation3], 48   ;;  %p924_p0 = pmov %p923_p8 }
  0x49   : > { %651 = vsyncadd (%p924_p0), [#allocation3], 4294967248  ;;  %p925_p6 = pmov %p924_p0 }
  0x4a   : > { %p926_p4 = pmov %p924_p0 }
  0x4b   : > { %653 = dma.done.wait (%p925_p6), [#allocation6], 48  }
  0x4c   : > { %655 = vsyncadd (%p926_p4), [#allocation6], 4294967248  ;;  %s206_s0 = sand.u32 1, %s749_s18   ;;  %s208_s4 = sand.u32 1, %s670_s13  }
  0x4d   : > { %s427_s29 = smul.u32 6, %s208_s4  ;;  %s207_s25 = scalar_lea.sflag [#allocation3], %s206_s0 }
  0x4f   : > { %s210_s28 = scalar_lea.vmem [#allocation7], %s427_s29 }
  0x50   : > { %657 = dma.done.wait (%p766_p7), %s207_s25, 96  }
  0x51   : > { %659 = vsyncadd (%p766_p7), %s207_s25, 4294967200  ;;  %s232_s10 = scalar_lea.vmem [#allocation8], %s427_s29  ;;  %s428_s19 = smul.u32 96, %s678_s15  ;;  %v233_v0 = vld [vmem:[%s210_s28] sm:$0x3] }
  0x52   : > { %s302_s11 = sshll.u32 %s232_s10, 4  ;;  %v416_v1 = vld [vmem:[#allocation2] ss:$0 sm:$0xff]  ;;  %v419_v2 = vld [vmem:[#allocation5] ss:$0 sm:$0xff]  ;;  %s862_s21 = scalar_lea.sflag [#allocation4], %s208_s4  ;;  %s855_s11 = int_to_ptr.vmem [resolvable:$true] %s302_s11 }
  0x53   : > { %v257_v3 = vmul.f32 %v416_v1, %v233_v0  ;;  %v234_v4 = vld [vmem:[%s210_s28 + $0x2] sm:$0x3]  ;;  %v417_v5 = vld [vmem:[#allocation2 + $0x1] ss:$0 sm:$0xff]  ;;  %v420_v6 = vld [vmem:[#allocation5 + $0x1] ss:$0 sm:$0xff]  ;;  %s860_s22 = scalar_lea.hbm %s911_s3, %s428_s19 }
  0x54   : > { %v258_v7 = vmul.f32 %v417_v5, %v234_v4  ;;  %v235_v8 = vld [vmem:[%s210_s28 + $0x4] sm:$0x3]  ;;  %v418_v9 = vld [vmem:[#allocation2 + $0x2] ss:$0 sm:$0xff]  ;;  %v421_v10 = vld [vmem:[#allocation5 + $0x2] ss:$0 sm:$0xff] }
  0x55   : > { %v281_v11 = vadd.f32 %v419_v2, %v257_v3  ;;  %v259_v12 = vmul.f32 %v418_v9, %v235_v8  ;;  %s598_s26 = scalar_lea.vmem %s855_s11, 96  ;;  %p927_p12 = scmp.ne.s32.totalorder %s917_s23, 0 }
  0x56   : > { %v282_v13 = vadd.f32 %v420_v6, %v258_v7  ;;  %p599_p7 = scmp.ne.s32.totalorder %s855_s11, %s598_s26  ;;  %s695_s7 = smov [#allocation8]  }
  0x57   : > { %284 = vst [vmem:[%s232_s10] sm:$0x3] %v281_v11  ;;  %v283_v14 = vadd.f32 %v421_v10, %v259_v12  ;;  %s602_s8 = sshll.u32 %s695_s7, 4  ;;  %s603_s8 = int_to_ptr.vmem [resolvable:$false] %s602_s8 }
  0x58   : > { %285 = vst [vmem:[%s232_s10 + $0x2] sm:$0x3] %v282_v13  ;;  %p600_p2 = pnand %p599_p7, %p927_p12  ;;  %s604_s5 = scalar_lea.vmem %s603_s8, 192 }
  0x59   : > { %286 = vst [vmem:[%s232_s10 + $0x4] sm:$0x3] %v283_v14  ;;  %p605_p5 = scmp.lt.s32.totalorder %s855_s11, %s603_s8  ;;  %p606_p1 = scmp.lt.s32.totalorder %s604_s5, %s598_s26 }
  0x5a   : > { %p601_p13 = pneg %p600_p2 }
  0x5b   : > { %p607_p10 = por %p606_p1, %p605_p5 }
  0x5d   : > { %p608_p11 = pnand %p607_p10, %p601_p13 }
  0x5f   : > { %611 = shalt.err (!%p608_p11)
}
  0x60   : > { %s612_s9 = scalar_lea.hbm %s860_s22, 96  ;;  %s616_s0 = scalar_lea.hbm %s911_s3, 192 }
  0x61   : > { %p613_p3 = scmp.ne.s32.totalorder %s860_s22, %s612_s9  ;;  %p617_p0 = scmp.lt.s32.totalorder %s860_s22, %s911_s3 }
  0x62   : > { %p618_p6 = scmp.lt.s32.totalorder %s616_s0, %s612_s9 }
  0x63   : > { %p614_p9 = pnand %p613_p3, %p927_p12 }
  0x64   : > { %p619_p4 = por %p618_p6, %p617_p0 }
  0x65   : > { %p615_p8 = pneg %p614_p9 }
  0x67   : > { %p620_p7 = pnand %p619_p4, %p615_p8 }
  0x69   : > { %623 = shalt.err (!%p620_p7)
}
  0x6a   : > { %s696_s25 = smov 32   ;;  %s697_s28 = smov 2  }
  0x6b   : > { %439 = dma.vmem_to_hbm [thread:$0]  (%p927_p12), %s855_s11, 96, %s860_s22, %s862_s21, %s696_s25, %s696_s25, %s697_s28  }
  0x6c PF: > { %s317_s10 = sand.u32 1, %s666_s12   ;;  %p928_p2 = scmp.ne.s32.totalorder %s918_s24, 0 }
  0x6d   : > { %p929_p13 = scmp.ge.s32.totalorder %s686_s17, 2  ;;  %s318_s19 = scalar_lea.sflag [#allocation4], %s317_s10 }
  0x6f   : > { %p453_p5 = pnand %p929_p13, %p928_p2 }
  0x71   : > { %p454_p1 = pneg %p453_p5 }
  0x73   : > { %661 = dma.done.wait (%p454_p1), %s318_s19, 96  }
  0x74   : > { %663 = vsyncadd (%p454_p1), %s318_s19, 4294967200  ;;  %s18_s17 = sadd.s32 1, %s686_s17   ;;  %s930_s12 = smov %s670_s13 }
  0x75   : > { %p15_p10 = scmp.ge.s32.totalorder %s18_s17, 4   ;;  %s931_s13 = smov %s674_s14 }
  0x76   : > { %s932_s14 = smov %s832_s30  ;;  %s933_s15 = smov %s682_s16 }
  0x77   : > { %s934_s16 = smov %s936_s27  ;;  %17 = sbr.rel (!%p15_p10) target bundleno = 8 (0x8), region = 84 }
  0x7c   :  { %323 = vsyncpa [#allocation3], 1 }
  0x7d   :  { %325 = vsyncpa [#allocation3 + $0x1], 1 }
  0x7e   :  { %326 = vsyncpa [#allocation6], 1 }
  0x7f   :  { %327 = vsyncpa [#allocation4], 1 }
  0x80   :  { %329 = vsyncpa [#allocation4 + $0x1], 1 }

</bundles_post_ra>
